<compile_context>
chip_gen: v6e
topology: v6e:2x2x1
jax: 0.10.0
libtpu: 0.0.40
codegen_flags: <defaults>
</compile_context>

<pallas_src>
import functools

import jax
import jax.numpy as jnp
from jax.experimental import pallas as pl
from jax.experimental.pallas import tpu as pltpu


# ----------------------------- Pallas kernel --------------------------------
def _duality_kernel(px_ref, wsa_ref, wp_ref, bsa_ref, bp_ref, o_ref, *,
                    epsilon, oc):
    px = px_ref[...]                                       # (K, TM) f32 patches

    # Product-path operand computed on-chip from f32 data (EUP slot); the
    # separate log-patch HBM stream of the original lowering stays gone.
    plog = jnp.log(px + epsilon)

    # One packed dot for the two paths that share P (sum | alpha).
    sa = jnp.dot(wsa_ref[...], px,
                 preferred_element_type=jnp.float32) + bsa_ref[...]      # (2*OC, TM)
    prod_log = jnp.dot(wp_ref[...], plog,
                       preferred_element_type=jnp.float32) + bp_ref[...]  # (OC, TM)

    sum_path = sa[:oc, :]
    alpha = jax.nn.sigmoid(sa[oc:, :])
    prod_path = jnp.exp(prod_log)

    out = prod_path + alpha * (sum_path - prod_path)       # == a*sum + (1-a)*prod
    o_ref[...] = jnp.maximum(out, 0.0).astype(o_ref.dtype)  # relu, dense bf16 store


# ------------------------------ glue (JAX) -----------------------------------
def _im2col_t(x, KH, KW):
    """x: [B, C, H, W] -> transposed patches [C*KH*KW, B*OH*OW] (valid, stride 1).

    Row index k = c*KH*KW + kh*KW + kw matches torch weight.reshape(OC, C*KH*KW);
    column index m = b*OH*OW + oh*OW + ow."""
    B, C, H, W = x.shape
    OH, OW = H - KH + 1, W - KW + 1
    cols = []
    for i in range(KH):
        for j in range(KW):
            cols.append(x[:, :, i:i + OH, j:j + OW])       # [B, C, OH, OW]
    p = jnp.stack(cols, axis=2)                            # [B, C, KH*KW, OH, OW]
    p = p.transpose(1, 2, 0, 3, 4).reshape(C * KH * KW, B * OH * OW)
    return p, OH, OW


def _two_tensorcore_device():
    # v7x packs 2 TensorCores per chip; v5e/v6e have 1.  Unknown device kinds
    # fall back to the single-core policy (correct either way).
    try:
        kind = jax.devices()[0].device_kind.lower()
    except Exception:
        return False
    return ("v7" in kind) or ("7x" in kind)


def _choose_tiling(M, *, lane=128, tm_max=1024, two_tc=False):
    """Pick (num_tiles, TM): TM a 128-lane multiple <= tm_max, balanced tiles.

    On 2-TensorCore parts (v7x) keep an even tile count >= 2 so both cores get
    work; on single-TC v5e/v6e use the minimum count (a padding-only extra
    grid step would be pure wasted DMA there)."""
    max_real_tiles = max(1, -(-M // lane))        # tiles that hold >=1 real lane-block
    num_tiles = max(1, -(-M // tm_max))
    if two_tc:
        num_tiles = max(2, num_tiles + (num_tiles % 2))
    num_tiles = min(num_tiles, max_real_tiles)
    rows_per_tile = -(-M // num_tiles)
    tm = -(-rows_per_tile // lane) * lane
    return num_tiles, tm


@functools.partial(jax.jit, static_argnames=("kernel_size", "epsilon"))
def duality_conv2d(x, params, *, kernel_size, epsilon=1e-6):
    """x: [B, C, H, W] float32 (strictly positive, as the torch module requires
    for log). params: dict of torch-layout weights/biases. Returns NCHW f32."""
    KH, KW = kernel_size
    B, C, H, W = x.shape
    OC = params["w_sum"].shape[0]
    K = C * KH * KW

    px_t, OH, OW = _im2col_t(x, KH, KW)                    # (K, M) f32
    M = B * OH * OW

    num_tiles, TM = _choose_tiling(M, two_tc=_two_tensorcore_device())
    M_pad = num_tiles * TM

    # Pad the M (lane) axis with 1.0 so the in-kernel log() is benign for the
    # padded columns even if epsilon == 0; they are sliced off afterwards.
    px_t = jnp.pad(px_t, ((0, 0), (0, M_pad - M)), constant_values=1.0)

    # Unpadded weights: packing sum|alpha keeps one dot for both px paths.
    wsa = jnp.concatenate([params["w_sum"].reshape(OC, K),
                           params["w_alpha"].reshape(OC, K)], axis=0)   # (2*OC, K)
    wp = params["w_prod"].reshape(OC, K)                                # (OC,  K)
    bsa = jnp.concatenate([params["b_sum"], params["b_alpha"]])[:, None]  # (2*OC, 1)
    bp = params["b_prod"][:, None]                                        # (OC,  1)

    kernel = functools.partial(_duality_kernel, epsilon=epsilon, oc=OC)

    out_t = pl.pallas_call(
        kernel,
        out_shape=jax.ShapeDtypeStruct((OC, M_pad), jnp.bfloat16),
        grid=(num_tiles,),
        in_specs=[
            pl.BlockSpec((K, TM), lambda i: (0, i)),        # patches of x (transposed)
            pl.BlockSpec((2 * OC, K), lambda i: (0, 0)),    # W_sum | W_alpha
            pl.BlockSpec((OC, K), lambda i: (0, 0)),        # W_prod
            pl.BlockSpec((2 * OC, 1), lambda i: (0, 0)),    # b_sum | b_alpha
            pl.BlockSpec((OC, 1), lambda i: (0, 0)),        # b_prod
        ],
        out_specs=pl.BlockSpec((OC, TM), lambda i: (0, i)),  # lane-dense out^T
        compiler_params=pltpu.CompilerParams(
            dimension_semantics=("parallel",),
            # Actual per-step footprint is ~0.5 MiB; 32 MiB stays well under
            # v7x's 64 MiB physical VMEM and every scoped default.
            vmem_limit_bytes=32 * 1024 * 1024),
    )(px_t, wsa, wp, bsa, bp)

    # NCHW to match the torch module.  This readback now touches only the
    # small dense bf16 array (drop the transpose entirely if the consumer
    # accepts channel-major output).
    out = out_t[:, :M].astype(jnp.float32)
    out = out.reshape(OC, B, OH, OW).transpose(1, 0, 2, 3)
    return out


# ----------------------------- reference (JAX) -------------------------------
def duality_conv2d_ref(x, params, *, kernel_size, epsilon=1e-6):
    dn = ("NCHW", "OIHW", "NCHW")

    def conv(inp, w, b):
        y = jax.lax.conv_general_dilated(inp, w, window_strides=(1, 1),
                                         padding="VALID", dimension_numbers=dn)
        return y + b[None, :, None, None]

    sum_path = conv(x, params["w_sum"], params["b_sum"])
    prod_path = jnp.exp(conv(jnp.log(x + epsilon),
                             params["w_prod"], params["b_prod"]))
    alpha = jax.nn.sigmoid(conv(x, params["w_alpha"], params["b_alpha"]))
    return jnp.maximum(alpha * sum_path + (1.0 - alpha) * prod_path, 0.0)


# --------------------------------- main ---------------------------------------
if __name__ == "__main__":
    B, C, H, W = 2, 4, 16, 16
    OC = 8
    KH = KW = 3

    key = jax.random.PRNGKey(0)
    k_x, k1, k2, k3, k4, k5, k6 = jax.random.split(key, 7)

    # strictly positive input so log(x + eps) is finite (the torch module
    # applies log to x + eps directly and would NaN on negatives as well)
    x = jax.random.uniform(k_x, (B, C, H, W), jnp.float32, 0.1, 1.0)

    fan_in = C * KH * KW
    scale = 1.0 / jnp.sqrt(fan_in)
    params = {
        "w_sum":   jax.random.uniform(k1, (OC, C, KH, KW), jnp.float32, -scale, scale),
        "b_sum":   jax.random.uniform(k2, (OC,), jnp.float32, -scale, scale),
        "w_prod":  jax.random.uniform(k3, (OC, C, KH, KW), jnp.float32, -scale, scale),
        "b_prod":  jax.random.uniform(k4, (OC,), jnp.float32, -scale, scale),
        "w_alpha": jax.random.uniform(k5, (OC, C, KH, KW), jnp.float32, -scale, scale),
        "b_alpha": jax.random.uniform(k6, (OC,), jnp.float32, -scale, scale),
    }

    out = duality_conv2d(x, params, kernel_size=(KH, KW), epsilon=1e-6)
    out = jax.block_until_ready(out)

    ref = duality_conv2d_ref(x, params, kernel_size=(KH, KW), epsilon=1e-6)
    assert out.shape == (B, OC, H - KH + 1, W - KW + 1), out.shape
    # MXU default precision + bf16 output cast vs. an f32 reference; the exp()
    # in the product path amplifies rounding, hence the tolerance.
    assert jnp.allclose(out, ref, atol=3e-2, rtol=5e-2), \
        float(jnp.max(jnp.abs(out - ref)))

    print("KERNEL_OK")
</pallas_src>

<mosaic_0001>
module attributes {stable_mosaic.version = 11 : i64} {
  func.func @_duality_kernel(%arg0: i32, %arg1: memref<36x512xf32, #tpu.memory_space<vmem>>, %arg2: memref<16x36xf32, #tpu.memory_space<vmem>>, %arg3: memref<8x36xf32, #tpu.memory_space<vmem>>, %arg4: memref<16x1xf32, #tpu.memory_space<vmem>>, %arg5: memref<8x1xf32, #tpu.memory_space<vmem>>, %arg6: memref<8x512xbf16, #tpu.memory_space<vmem>>) attributes {dimension_semantics = [#tpu.dimension_semantics<parallel>], iteration_bounds = array<i64: 1>, scalar_prefetch = 0 : i64, scratch_operands = 0 : i64, tpu.core_type = #tpu.core_type<tc>, window_params = [{transform_indices = @transform_0, window_bounds = array<i64: 36, 512>}, {pipeline_mode = #tpu.pipeline_mode<synchronous>, transform_indices = @transform_1, window_bounds = array<i64: 16, 36>}, {pipeline_mode = #tpu.pipeline_mode<synchronous>, transform_indices = @transform_2, window_bounds = array<i64: 8, 36>}, {pipeline_mode = #tpu.pipeline_mode<synchronous>, transform_indices = @transform_3, window_bounds = array<i64: 16, 1>}, {pipeline_mode = #tpu.pipeline_mode<synchronous>, transform_indices = @transform_4, window_bounds = array<i64: 8, 1>}, {transform_indices = @transform_5, window_bounds = array<i64: 8, 512>}]} {
    %c0 = arith.constant 0 : index
    %c0_0 = arith.constant 0 : index
    %0 = vector.load %arg1[%c0, %c0_0] : memref<36x512xf32, #tpu.memory_space<vmem>>, vector<36x512xf32>
    %cst = arith.constant 9.99999997E-7 : f32
    %1 = vector.broadcast %cst : f32 to vector<36x512xf32>
    %2 = arith.addf %0, %1 : vector<36x512xf32>
    %3 = math.log %2 : vector<36x512xf32>
    %c0_1 = arith.constant 0 : index
    %c0_2 = arith.constant 0 : index
    %4 = vector.load %arg2[%c0_1, %c0_2] : memref<16x36xf32, #tpu.memory_space<vmem>>, vector<16x36xf32>
    %cst_3 = arith.constant dense<0.000000e+00> : vector<16x512xf32>
    %5 = tpu.matmul %4, %0, %cst_3 {dimension_numbers = #tpu.dot_dimension_numbers<[1], [0], [0], [1], [0, 0, 1, 1], [], []>} : vector<16x36xf32>, vector<36x512xf32>, vector<16x512xf32> -> vector<16x512xf32>
    %c0_4 = arith.constant 0 : index
    %c0_5 = arith.constant 0 : index
    %6 = vector.load %arg4[%c0_4, %c0_5] : memref<16x1xf32, #tpu.memory_space<vmem>>, vector<16x1xf32>
    %7 = vector.broadcast %6 : vector<16x1xf32> to vector<16x512xf32>
    %8 = arith.addf %5, %7 : vector<16x512xf32>
    %c0_6 = arith.constant 0 : index
    %c0_7 = arith.constant 0 : index
    %9 = vector.load %arg3[%c0_6, %c0_7] : memref<8x36xf32, #tpu.memory_space<vmem>>, vector<8x36xf32>
    %cst_8 = arith.constant dense<0.000000e+00> : vector<8x512xf32>
    %10 = tpu.matmul %9, %3, %cst_8 {dimension_numbers = #tpu.dot_dimension_numbers<[1], [0], [0], [1], [0, 0, 1, 1], [], []>} : vector<8x36xf32>, vector<36x512xf32>, vector<8x512xf32> -> vector<8x512xf32>
    %c0_9 = arith.constant 0 : index
    %c0_10 = arith.constant 0 : index
    %11 = vector.load %arg5[%c0_9, %c0_10] : memref<8x1xf32, #tpu.memory_space<vmem>>, vector<8x1xf32>
    %12 = vector.broadcast %11 : vector<8x1xf32> to vector<8x512xf32>
    %13 = arith.addf %10, %12 : vector<8x512xf32>
    %14 = vector.extract_strided_slice %8 {offsets = [0, 0], sizes = [8, 512], strides = [1, 1]} : vector<16x512xf32> to vector<8x512xf32>
    %15 = vector.extract_strided_slice %8 {offsets = [8, 0], sizes = [8, 512], strides = [1, 1]} : vector<16x512xf32> to vector<8x512xf32>
    %16 = arith.negf %15 : vector<8x512xf32>
    %17 = math.exp %16 : vector<8x512xf32>
    %cst_11 = arith.constant 1.000000e+00 : f32
    %18 = vector.broadcast %cst_11 : f32 to vector<8x512xf32>
    %19 = arith.addf %18, %17 : vector<8x512xf32>
    %20 = arith.divf %18, %19 : vector<8x512xf32>
    %21 = math.exp %13 : vector<8x512xf32>
    %22 = arith.subf %14, %21 : vector<8x512xf32>
    %23 = arith.mulf %20, %22 : vector<8x512xf32>
    %24 = arith.addf %21, %23 : vector<8x512xf32>
    %cst_12 = arith.constant 0.000000e+00 : f32
    %25 = vector.broadcast %cst_12 : f32 to vector<8x512xf32>
    %26 = arith.maximumf %24, %25 : vector<8x512xf32>
    %27 = arith.truncf %26 : vector<8x512xf32> to vector<8x512xbf16>
    %c0_13 = arith.constant 0 : index
    %c0_14 = arith.constant 0 : index
    %28 = vector.load %arg6[%c0_13, %c0_14] : memref<8x512xbf16, #tpu.memory_space<vmem>>, vector<8x512xbf16>
    tpu.vector_store %arg6[%c0_13, %c0_14], %27 {strides = array<i32>} : memref<8x512xbf16, #tpu.memory_space<vmem>>, vector<8x512xbf16>,
    return
  }
  func.func @transform_0(%arg0: i32) -> (i32, i32) {
    %c0_i32 = arith.constant 0 : i32
    %c0_i32_0 = arith.constant 0 : i32
    return %c0_i32, %arg0 : i32, i32
  }
  func.func @transform_1(%arg0: i32) -> (i32, i32) {
    %c0_i32 = arith.constant 0 : i32
    %c0_i32_0 = arith.constant 0 : i32
    %c0_i32_1 = arith.constant 0 : i32
    return %c0_i32, %c0_i32_0 : i32, i32
  }
  func.func @transform_2(%arg0: i32) -> (i32, i32) {
    %c0_i32 = arith.constant 0 : i32
    %c0_i32_0 = arith.constant 0 : i32
    %c0_i32_1 = arith.constant 0 : i32
    return %c0_i32, %c0_i32_0 : i32, i32
  }
  func.func @transform_3(%arg0: i32) -> (i32, i32) {
    %c0_i32 = arith.constant 0 : i32
    %c0_i32_0 = arith.constant 0 : i32
    %c0_i32_1 = arith.constant 0 : i32
    return %c0_i32, %c0_i32_0 : i32, i32
  }
  func.func @transform_4(%arg0: i32) -> (i32, i32) {
    %c0_i32 = arith.constant 0 : i32
    %c0_i32_0 = arith.constant 0 : i32
    %c0_i32_1 = arith.constant 0 : i32
    return %c0_i32, %c0_i32_0 : i32, i32
  }
  func.func @transform_5(%arg0: i32) -> (i32, i32) {
    %c0_i32 = arith.constant 0 : i32
    %c0_i32_0 = arith.constant 0 : i32
    return %c0_i32, %arg0 : i32, i32
  }
}

</mosaic_0001>

<bundles_post_ra>
// kernel: duality_conv2d.1
= control target key start
LH: loop header
LB: loop body
LE: loop exit
PB: predicated region body
PF: predicated region fallthrough
CT: control target
= control target key end

     0   :  { %vm121_vm0 = vcmask 1043456   ;;  %v612_v3 = vmov 0.0   ;;  %v613_v10 = vmov 0   ;;  %vm114_vm1 = vcmask 293888   ;;  %s748_s0 = inlined_call_operand.vmem [shape: f32[36,512], index: 0, kind: input, shape index: {}]   ;;  %s749_s1 = inlined_call_operand.vmem [shape: f32[16,36], index: 1, kind: input, shape index: {}]   ;;  %s750_s3 = inlined_call_operand.vmem [shape: f32[16,1], index: 3, kind: input, shape index: {}]   ;;  %s751_s4 = inlined_call_operand.vmem [shape: f32[8,1], index: 4, kind: input, shape index: {}]   ;;  %s752_s2 = inlined_call_operand.vmem [shape: f32[8,36], index: 2, kind: input, shape index: {}]   ;;  %s753_s5 = inlined_call_operand.vmem [shape: bf16[8,512], index: 5, kind: output, shape index: {}]  }
   0x1   :  { %v37_v0 = vld [vmem:[%s748_s0 + $0x88] sm:$0xf]  ;;  %v39_v1 = vld [vmem:[%s748_s0 + $0x98] sm:$0xf]  ;;  %v36_v2 = vld [vmem:[%s748_s0 + $0x80] sm:$0xf]  ;;  %198 = vmatprep.mubr.f32.mxu0 %v612_v3  ;;  %275 = vmatprep.mubr.f32.mxu1 %v612_v3 }
   0x2   :  { %v57_v4 = vadd.f32 1e-06, %v37_v0  ;;  %522 = vmatprep.subr.msk.mxu0 %vm121_vm0, %v37_v0  ;;  %v59_v5 = vadd.f32 1e-06, %v39_v1  ;;  %526 = vmatprep.subr.msk.mxu1 %vm121_vm0, %v39_v1  ;;  %v56_v6 = vadd.f32 1e-06, %v36_v2 }
   0x3   :  { %523 = vmatpush1.msk.msra.mxu0 %vm121_vm0, %v36_v2  ;;  %v38_v7 = vld [vmem:[%s748_s0 + $0x90] sm:$0xf]  ;;  %v33_v8 = vld [vmem:[%s748_s0 + $0x68] sm:$0xff]  ;;  %v35_v9 = vld [vmem:[%s748_s0 + $0x78] sm:$0xff]  ;;  %547 = vset.pattern.permute.xlu1 %v613_v10 }
   0x4   :  { %548 = vlog2.f32 %v57_v4  ;;  %v58_v11 = vadd.f32 1e-06, %v38_v7  ;;  %527 = vmatpush1.msk.msra.mxu1 %vm121_vm0, %v38_v7  ;;  %v53_v12 = vadd.f32 1e-06, %v33_v8  ;;  %158 = vmatprep.subr.mxu0 %v33_v8  ;;  %v55_v13 = vadd.f32 1e-06, %v35_v9 }
   0x5   :  { %550 = vlog2.f32 %v59_v5  ;;  %235 = vmatprep.subr.mxu1 %v35_v9  ;;  %v32_v14 = vld [vmem:[%s748_s0 + $0x60] sm:$0xff]  ;;  %v34_v15 = vld [vmem:[%s748_s0 + $0x70] sm:$0xff]  ;;  %v29_v16 = vld [vmem:[%s748_s0 + $0x48] sm:$0xff]  ;;  %546 = vset.pattern.permute.xlu0 %v613_v10 }
   0x6   :  { %552 = vlog2.f32 %v56_v6  ;;  %v52_v17 = vadd.f32 1e-06, %v32_v14  ;;  %159 = vmatpush1.msra.mxu0 %v32_v14  ;;  %236 = vmatpush1.msra.mxu1 %v34_v15  ;;  %v54_v18 = vadd.f32 1e-06, %v34_v15  ;;  %v31_v19 = vld [vmem:[%s748_s0 + $0x58] sm:$0xff]  ;;  %v28_v20 = vld [vmem:[%s748_s0 + $0x40] sm:$0xff] }
   0x7   :  { %554 = vlog2.f32 %v58_v11  ;;  %160 = vmatprep.subr.mxu0 %v29_v16  ;;  %v30_v21 = vld [vmem:[%s748_s0 + $0x50] sm:$0xff]  ;;  %v49_v22 = vadd.f32 1e-06, %v29_v16  ;;  %237 = vmatprep.subr.mxu1 %v31_v19  ;;  %v51_v23 = vadd.f32 1e-06, %v31_v19  ;;  %v25_v24 = vld [vmem:[%s748_s0 + $0x28] sm:$0xff] }
   0x8   :  { %556 = vlog2.f32 %v53_v12  ;;  %161 = vmatpush1.msra.mxu0 %v28_v20  ;;  %238 = vmatpush1.msra.mxu1 %v30_v21  ;;  %v27_v25 = vld [vmem:[%s748_s0 + $0x38] sm:$0xff]  ;;  %v24_v26 = vld [vmem:[%s748_s0 + $0x20] sm:$0xff]  ;;  %v48_v27 = vadd.f32 1e-06, %v28_v20  ;;  %v50_v28 = vadd.f32 1e-06, %v30_v21 }
   0x9   :  { %558 = vlog2.f32 %v55_v13  ;;  %162 = vmatprep.subr.mxu0 %v25_v24  ;;  %239 = vmatprep.subr.mxu1 %v27_v25  ;;  %v26_v29 = vld [vmem:[%s748_s0 + $0x30] sm:$0xff]  ;;  %v21_v30 = vld [vmem:[%s748_s0 + $0x8] sm:$0xff]  ;;  %v23_v31 = vld [vmem:[%s748_s0 + $0x18] sm:$0xff]  ;;  %v45_v32 = vadd.f32 1e-06, %v25_v24 }
   0xa   :  { %560 = vlog2.f32 %v52_v17  ;;  %163 = vmatpush1.msra.mxu0 %v24_v26  ;;  %240 = vmatpush1.msra.mxu1 %v26_v29  ;;  %v47_v33 = vadd.f32 1e-06, %v27_v25  ;;  %v20_v34 = vld [vmem:[%s748_s0] sm:$0xff]  ;;  %v22_v35 = vld [vmem:[%s748_s0 + $0x10] sm:$0xff]  ;;  %v44_v37 = vadd.f32 1e-06, %v24_v26 }
   0xb   :  { %562 = vlog2.f32 %v54_v18  ;;  %164 = vmatprep.subr.mxu0 %v21_v30  ;;  %241 = vmatprep.subr.mxu1 %v23_v31  ;;  %v100_v36 = vld [vmem:[%s749_s1] sm:$0xff]  ;;  %v46_v38 = vadd.f32 1e-06, %v26_v29  ;;  %v103_v40 = vld [vmem:[%s750_s3 + $0x8] sm:$0xff]  ;;  %v41_v41 = vadd.f32 1e-06, %v21_v30 }
   0xc   :  { %564 = vlog2.f32 %v49_v22  ;;  %165 = vmatpush1.msra.mxu0 %v20_v34  ;;  %242 = vmatpush1.msra.mxu1 %v22_v35  ;;  %v102_v39 = vld [vmem:[%s750_s3] sm:$0xff]  ;;  %v101_v42 = vld [vmem:[%s749_s1 + $0x8] sm:$0xff]  ;;  %v43_v44 = vadd.f32 1e-06, %v23_v31  ;;  %v40_v47 = vadd.f32 1e-06, %v20_v34 }
   0xd   :  { %566 = vlog2.f32 %v51_v23  ;;  %524 = vmatmul.mubr.msk.f32.vlgmr.msra.gmra.mxu0 %vm114_vm1, %v100_v36  ;;  %528 = vmatmul.mubr.msk.f32.vlgmr.msra.gmra.mxu1 %vm114_vm1, %v100_v36  ;;  %v42_v50 = vadd.f32 1e-06, %v22_v35  ;;  %v289_v51 = vld [vmem:[%s751_s4] sm:$0xff] }
   0xe   :  { %568 = vlog2.f32 %v48_v27  ;;  %204 = vmatprep.mubr.f32.mxu0 %v612_v3  ;;  %281 = vmatprep.mubr.f32.mxu1 %v612_v3  ;;  %v288_v22 = vld [vmem:[%s752_s2] sm:$0xff] }
   0xf   :  { %570 = vlog2.f32 %v50_v28  ;;  %106 = vperm.xlu1 %547, %v102_v39   ;;  %111 = vperm.xlu0 %546, %v103_v40  }
  0x10   :  { %572 = vlog2.f32 %v45_v32 }
  0x11   :  { %v549_v43 = vpop.eup %548  ;;  %574 = vlog2.f32 %v47_v33  ;;  %525 = vmatmul.mubr.msk.f32.gmra.mxu0 %vm114_vm1, %v101_v42  ;;  %529 = vmatmul.mubr.msk.f32.gmra.mxu1 %vm114_vm1, %v101_v42 }
  0x12   :  { %v551_v45 = vpop.eup %550  ;;  %v95_v46 = vmul.f32 0.6931472, %v549_v43  ;;  %576 = vlog2.f32 %v44_v37  ;;  %374 = vmatprep.mubr.f32.mxu0 %v612_v3  ;;  %445 = vmatprep.mubr.f32.mxu1 %v612_v3 }
  0x13   :  { %v553_v48 = vpop.eup %552  ;;  %v99_v49 = vmul.f32 0.6931472, %v551_v45  ;;  %578 = vlog2.f32 %v46_v38  ;;  %292 = vperm.xlu0 %546, %v289_v51  }
  0x14   :  { %v555_v52 = vpop.eup %554  ;;  %v93_v53 = vmul.f32 0.6931472, %v553_v48  ;;  %580 = vlog2.f32 %v41_v41  ;;  %530 = vmatprep.subr.msk.mxu0 %vm121_vm0, %v95_v46 }
  0x15   :  { %v557_v54 = vpop.eup %556  ;;  %v97_v55 = vmul.f32 0.6931472, %v555_v52  ;;  %582 = vlog2.f32 %v43_v44  ;;  %533 = vmatprep.subr.msk.mxu1 %vm121_vm0, %v99_v49 }
  0x16   :  { %v559_v56 = vpop.eup %558  ;;  %584 = vlog2.f32 %v40_v47  ;;  %531 = vmatpush1.msk.msra.mxu0 %vm121_vm0, %v93_v53  ;;  %v87_v57 = vmul.f32 0.6931472, %v557_v54 }
  0x17   :  { %v561_v58 = vpop.eup %560  ;;  %586 = vlog2.f32 %v42_v50  ;;  %534 = vmatpush1.msk.msra.mxu1 %vm121_vm0, %v97_v55  ;;  %v91_v59 = vmul.f32 0.6931472, %v559_v56 }
  0x18   :  { %v563_v60 = vpop.eup %562  ;;  %v85_v61 = vmul.f32 0.6931472, %v561_v58  ;;  %334 = vmatprep.subr.mxu0 %v87_v57 }
  0x19   :  { %v565_v62 = vpop.eup %564  ;;  %v89_v63 = vmul.f32 0.6931472, %v563_v60  ;;  %405 = vmatprep.subr.mxu1 %v91_v59 }
  0x1a   :  { %v567_v0 = vpop.eup %566  ;;  %335 = vmatpush1.msra.mxu0 %v85_v61  ;;  %v79_v1 = vmul.f32 0.6931472, %v565_v62 }
  0x1b   :  { %v569_v2 = vpop.eup %568  ;;  %406 = vmatpush1.msra.mxu1 %v89_v63  ;;  %v83_v3 = vmul.f32 0.6931472, %v567_v0 }
  0x1c   :  { %v571_v4 = vpop.eup %570  ;;  %v77_v5 = vmul.f32 0.6931472, %v569_v2  ;;  %336 = vmatprep.subr.mxu0 %v79_v1 }
  0x1d   :  { %v573_v6 = vpop.eup %572  ;;  %v81_v7 = vmul.f32 0.6931472, %v571_v4  ;;  %407 = vmatprep.subr.mxu1 %v83_v3 }
  0x1e   :  { %v575_v8 = vpop.eup %574  ;;  %337 = vmatpush1.msra.mxu0 %v77_v5  ;;  %v71_v9 = vmul.f32 0.6931472, %v573_v6 }
  0x1f   :  { %v577_v10 = vpop.eup %576  ;;  %408 = vmatpush1.msra.mxu1 %v81_v7  ;;  %v75_v11 = vmul.f32 0.6931472, %v575_v8 }
  0x20   :  { %v579_v12 = vpop.eup %578  ;;  %v69_v13 = vmul.f32 0.6931472, %v577_v10  ;;  %338 = vmatprep.subr.mxu0 %v71_v9 }
  0x21   :  { %v581_v14 = vpop.eup %580  ;;  %v73_v15 = vmul.f32 0.6931472, %v579_v12  ;;  %409 = vmatprep.subr.mxu1 %v75_v11 }
  0x22   :  { %v583_v16 = vpop.eup %582  ;;  %339 = vmatpush1.msra.mxu0 %v69_v13  ;;  %v63_v17 = vmul.f32 0.6931472, %v581_v14 }
  0x23   :  { %v585_v18 = vpop.eup %584  ;;  %410 = vmatpush1.msra.mxu1 %v73_v15  ;;  %v67_v19 = vmul.f32 0.6931472, %v583_v16 }
  0x24   :  { %v587_v20 = vpop.eup %586  ;;  %v61_v21 = vmul.f32 0.6931472, %v585_v18  ;;  %340 = vmatprep.subr.mxu0 %v63_v17 }
  0x25   :  { %v65_v23 = vmul.f32 0.6931472, %v587_v20  ;;  %411 = vmatprep.subr.mxu1 %v67_v19 }
  0x26   :  { %341 = vmatpush1.msra.mxu0 %v61_v21 }
  0x27   :  { %412 = vmatpush1.msra.mxu1 %v65_v23  ;;  %532 = vmatmul.mubr.msk.f32.vlgmr.msra.gmra.mxu0 %vm114_vm1, %v288_v22 }
  0x28   :  { %535 = vmatmul.mubr.msk.f32.vlgmr.msra.gmra.mxu1 %vm114_vm1, %v288_v22 }
  0x8a   :  { %v112_v28 = vpop.permute.xlu0 %111  ;;  %v107_v63 = vpop.permute.xlu1 %106 }
  0x8e   :  { %v293_v46 = vpop.permute.xlu0 %292 }
  0xcd   :  { %v200_v24 = vpop.f32.mrf.mxu0  ;;  %v277_v25 = vpop.f32.mrf.mxu1 }
  0xce   :  { %v201_v3 = vadd.f32 %v200_v24, %v107_v63  ;;  %v278_v5 = vadd.f32 %v277_v25, %v107_v63 }
  0xcf   :  { %v202_v26 = vpop.f32.mrf.mxu0  ;;  %v279_v27 = vpop.f32.mrf.mxu1 }
  0xd0   :  { %v203_v7 = vadd.f32 %v202_v26, %v107_v63  ;;  %v280_v10 = vadd.f32 %v279_v27, %v107_v63 }
  0xd1   :  { %v206_v29 = vpop.f32.mrf.mxu0  ;;  %v283_v30 = vpop.f32.mrf.mxu1 }
  0xd2   :  { %v207_v31 = vadd.f32 %v206_v29, %v112_v28  ;;  %v284_v32 = vadd.f32 %v283_v30, %v112_v28 }
  0xd3   :  { %v208_v33 = vpop.f32.mrf.mxu0  ;;  %v285_v34 = vpop.f32.mrf.mxu1 }
  0xd4   :  { %v536_v35 = vmul.f32 -1.442695, %v207_v31  ;;  %v538_v36 = vmul.f32 -1.442695, %v284_v32  ;;  %v209_v37 = vadd.f32 %v208_v33, %v112_v28  ;;  %v286_v38 = vadd.f32 %v285_v34, %v112_v28 }
  0xd6   :  { %588 = vpow2.f32 %v536_v35  ;;  %v537_v39 = vmul.f32 -1.442695, %v209_v37  ;;  %v539_v40 = vmul.f32 -1.442695, %v286_v38 }
  0xd7   :  { %590 = vpow2.f32 %v538_v36 }
  0xd8   :  { %592 = vpow2.f32 %v537_v39 }
  0xd9   :  { %594 = vpow2.f32 %v539_v40 }
  0xe3   :  { %v589_v41 = vpop.eup %588 }
  0xe4   :  { %v591_v42 = vpop.eup %590  ;;  %v464_v43 = vadd.f32 1.0, %v589_v41 }
  0xe5   :  { %v593_v44 = vpop.eup %592  ;;  %v466_v45 = vadd.f32 1.0, %v591_v42 }
  0xe6   :  { %v595_v48 = vpop.eup %594  ;;  %596 = vrcp.f32 %v464_v43  ;;  %v465_v49 = vadd.f32 1.0, %v593_v44 }
  0xe7   :  { %v376_v47 = vpop.f32.mrf.mxu0  ;;  %598 = vrcp.f32 %v466_v45  ;;  %v467_v52 = vadd.f32 1.0, %v595_v48 }
  0xe8   :  { %v377_v50 = vadd.f32 %v376_v47, %v293_v46  ;;  %v447_v51 = vpop.f32.mrf.mxu1  ;;  %600 = vrcp.f32 %v465_v49 }
  0xe9   :  { %v448_v53 = vadd.f32 %v447_v51, %v293_v46  ;;  %v378_v54 = vpop.f32.mrf.mxu0  ;;  %602 = vrcp.f32 %v467_v52 }
  0xea   :  { %v476_v55 = vmul.f32 1.442695, %v377_v50  ;;  %v379_v56 = vadd.f32 %v378_v54, %v293_v46  ;;  %v449_v57 = vpop.f32.mrf.mxu1 }
  0xeb   :  { %v480_v58 = vmul.f32 1.442695, %v448_v53  ;;  %v450_v59 = vadd.f32 %v449_v57, %v293_v46 }
  0xec   :  { %604 = vpow2.f32 %v476_v55  ;;  %v478_v60 = vmul.f32 1.442695, %v379_v56 }
  0xed   :  { %606 = vpow2.f32 %v480_v58  ;;  %v482_v61 = vmul.f32 1.442695, %v450_v59 }
  0xee   :  { %608 = vpow2.f32 %v478_v60 }
  0xef   :  { %610 = vpow2.f32 %v482_v61 }
  0xf3   :  { %v597_v62 = vpop.eup %596 }
  0xf4   :  { %v599_v0 = vpop.eup %598 }
  0xf5   :  { %v601_v1 = vpop.eup %600 }
  0xf6   :  { %v603_v2 = vpop.eup %602 }
  0xf9   :  { %v605_v4 = vpop.eup %604 }
  0xfa   :  { %v607_v6 = vpop.eup %606  ;;  %v484_v8 = vsub.f32 %v201_v3, %v605_v4 }
  0xfb   :  { %v609_v9 = vpop.eup %608  ;;  %v486_v11 = vsub.f32 %v278_v5, %v607_v6 }
  0xfc   :  { %v611_v12 = vpop.eup %610  ;;  %v488_v13 = vmul.f32 %v597_v62, %v484_v8  ;;  %v485_v14 = vsub.f32 %v203_v7, %v609_v9 }
  0xfd   :  { %v490_v15 = vmul.f32 %v599_v0, %v486_v11  ;;  %v487_v16 = vsub.f32 %v280_v10, %v611_v12 }
  0xfe   :  { %v492_v17 = vadd.f32 %v605_v4, %v488_v13  ;;  %v489_v18 = vmul.f32 %v601_v1, %v485_v14 }
  0xff   :  { %v494_v19 = vadd.f32 %v607_v6, %v490_v15  ;;  %v491_v20 = vmul.f32 %v603_v2, %v487_v16 }
 0x100   :  { %v493_v21 = vadd.f32 %v609_v9, %v489_v18  ;;  %v496_v23 = vmax.f32 %v492_v17, 0.0 }
 0x101   :  { %v495_v22 = vadd.f32 %v611_v12, %v491_v20  ;;  %v498_v25 = vmax.f32 %v494_v19, 0.0 }
 0x102   :  { %v497_v24 = vmax.f32 %v493_v21, 0.0 }
 0x103   :  { %v499_v28 = vmax.f32 %v495_v22, 0.0 }
 0x104   :  { %v542_v26 = vpack.c.bf16 %v497_v24, %v496_v23 }
 0x105   :  { %v543_v29 = vpack.c.bf16 %v499_v28, %v498_v25 }
 0x106   :  { %516 = vst [vmem:[%s753_s5] sm:$0xff] %v542_v26 }
 0x107   :  { %517 = vst [vmem:[%s753_s5 + $0x8] sm:$0xff] %v543_v29 }

</bundles_post_ra>
